<compile_context>
chip_gen: v7x
topology: tpu7x:2x2x1
jax: 0.10.0
libtpu: 0.0.40
codegen_flags: <defaults>
</compile_context>

<pallas_src>
import numpy as np
import jax
import jax.numpy as jnp
from jax.experimental import pallas as pl
from jax.experimental.pallas import tpu as pltpu

PAD_ID = 0          # token_to_id['<pad>']
ALPHA = 2.0

_ARBITRARY = getattr(pltpu, "ARBITRARY", "arbitrary")
_CORE_PARALLEL = getattr(pltpu, "CORE_PARALLEL", getattr(pltpu, "PARALLEL", "parallel"))


def _round_up(x, m):
    return ((x + m - 1) // m) * m


def _device_kind():
    try:
        return jax.devices()[0].device_kind.lower()
    except Exception:
        return ""


def _vmem_budgets():
    """(vmem_limit_bytes, logits_tile_budget_bytes) sized for the local chip."""
    kind = _device_kind()
    cap = None
    try:
        cap = int(pltpu.get_tpu_info().vmem_capacity_bytes)
    except Exception:
        cap = None
    if cap is None:
        cap = (64 << 20) if "v7" in kind else (128 << 20)
    if "v7" in kind:                       # v7x: 64 MiB per TensorCore
        cap = min(cap, 64 << 20)
    if cap >= (96 << 20):                  # v5e / v6e: 128 MiB physical VMEM
        return 100 << 20, 88 << 20
    return 48 << 20, 38 << 20              # v7x-class


def _num_tensorcores():
    """Number of TensorCores per chip (2-way split only helps on v7x-class chips)."""
    try:
        info = pltpu.get_tpu_info()
        for attr in ("num_cores", "num_tensorcores", "tensorcore_count"):
            nc = getattr(info, attr, None)
            if nc:
                return max(1, int(nc))
    except Exception:
        pass
    return 2 if "v7" in _device_kind() else 1


def _pick_row_tile(n_rows, vocab, in_bytes, logits_budget):
    """Byte-targeted row tile: ~8 MiB of logits per tile, bounded by the VMEM model."""
    # double-buffered native-dtype logits tile + ~2 full-tile f32 temporaries (upcast, exp)
    # + lane-padded (row_tile, 1) vectors (targets x2 buffers, 2 accumulators, keepdims temps)
    per_row = 2 * vocab * in_bytes + 2 * vocab * 4 + 10 * 128 * 4
    budget_rows = max(logits_budget // per_row, 1)
    target_rows = max(1024, (8 << 20) // max(vocab * in_bytes, 1))   # >= ~8 MiB of logits
    rt = int(min(budget_rows, target_rows))
    mult = 16 if in_bytes < 4 else 8       # prefer 16-row multiples for packed dtypes
    rt = max(mult, (rt // mult) * mult)
    rt = min(rt, _round_up(n_rows, 8))     # never tile beyond the (8-rounded) row count
    rt = max(8, (rt // 8) * 8)             # hard (8,·) legality floor
    return rt


def _make_ce_kernel(n_rows, row_tile, steps_per_core):
    def kernel(logits_ref, tgt_ref, out_ref, ce_acc, cnt_acc):
        c = pl.program_id(0)          # TensorCore split (core_parallel on 2-TC chips)
        i = pl.program_id(1)          # row-tile reduction ("arbitrary")

        @pl.when(i == 0)
        def _():
            ce_acc[...] = jnp.zeros_like(ce_acc)
            cnt_acc[...] = jnp.zeros_like(cnt_acc)

        x = logits_ref[...]                              # (row_tile, V), NATIVE dtype
        tgt = tgt_ref[...]                               # (row_tile, 1) int32
        tn, v = x.shape

        # Un-clamped global row ids of this tile -> masks both the ragged tail of the last
        # real block and any fully-out-of-range duplicate block produced by the clamp.
        block_idx = c * steps_per_core + i
        row_ids = block_idx * row_tile + jax.lax.broadcasted_iota(jnp.int32, (tn, 1), 0)
        row_valid = row_ids < n_rows

        # Row max + target-logit gather in the native dtype (exact for bf16; 2x vreg packing
        # on v6e/v7x). Lane index kept as (1, V) and broadcast against the (tn, 1) targets.
        m = jnp.max(x, axis=-1, keepdims=True).astype(jnp.float32)
        lane = jax.lax.broadcasted_iota(jnp.int32, (1, v), 1)
        hit = lane == tgt                                # (tn, v) via broadcast
        tgt_logit = jnp.sum(jnp.where(hit, x, jnp.array(0, x.dtype)),
                            axis=-1, keepdims=True).astype(jnp.float32)

        # Stable log-sum-exp: only the exp path is upcast to f32 (bf16->f32 is lossless).
        # If the EUP slot ever saturates on v7x, exp could run in bf16 with an f32 sum.
        xf = x.astype(jnp.float32)
        lse = m + jnp.log(jnp.sum(jnp.exp(xf - m), axis=-1, keepdims=True))

        ce = lse - tgt_logit                             # -log_softmax[target]
        valid = jnp.logical_and(row_valid, tgt != PAD_ID)

        # where-masking (not multiplication) so garbage rows from padded/duplicate DMA
        # windows can never inject NaN/Inf into the accumulators.
        ce_acc[...] += jnp.where(valid, ce, 0.0)
        cnt_acc[...] += valid.astype(jnp.float32)

        @pl.when(i == pl.num_programs(1) - 1)
        def _():
            ce_tot = jnp.sum(ce_acc[...], axis=0, keepdims=True)    # (1, 1)
            ct_tot = jnp.sum(cnt_acc[...], axis=0, keepdims=True)   # (1, 1)
            out_ref[...] = jnp.concatenate([ce_tot, ct_tot], axis=1)[None, :, :]

    return kernel


def _ce_sums(logits, tgt):
    """Returns [sum(CE over non-pad rows), count(non-pad rows)] as a (2,) f32 array."""
    n_rows, vocab = logits.shape
    in_bytes = jnp.dtype(logits.dtype).itemsize

    vmem_limit, logits_budget = _vmem_budgets()
    num_cores = _num_tensorcores()
    row_tile = _pick_row_tile(n_rows, vocab, in_bytes, logits_budget)

    steps_total = pl.cdiv(n_rows, row_tile)
    steps_per_core = pl.cdiv(steps_total, num_cores)

    def row_block(c, i):
        # Clamp so every DMA window starts inside the array; duplicate blocks produced by
        # the clamp contribute nothing thanks to the in-kernel row mask.
        return jnp.minimum(c * steps_per_core + i, steps_total - 1)

    core_sem = _CORE_PARALLEL if num_cores > 1 else _ARBITRARY

    kernel = _make_ce_kernel(n_rows, row_tile, steps_per_core)
    out = pl.pallas_call(
        kernel,
        out_shape=jax.ShapeDtypeStruct((num_cores, 1, 2), jnp.float32),
        grid_spec=pltpu.PrefetchScalarGridSpec(
            num_scalar_prefetch=0,
            grid=(num_cores, steps_per_core),
            in_specs=[
                pl.BlockSpec((row_tile, vocab), lambda c, i: (row_block(c, i), 0)),
                pl.BlockSpec((row_tile, 1), lambda c, i: (row_block(c, i), 0)),
            ],
            out_specs=pl.BlockSpec((1, 1, 2), lambda c, i: (c, 0, 0)),
            scratch_shapes=[
                pltpu.VMEM((row_tile, 1), jnp.float32),   # per-row CE partials (per core)
                pltpu.VMEM((row_tile, 1), jnp.float32),   # per-row valid-count partials
            ],
        ),
        compiler_params=pltpu.CompilerParams(
            dimension_semantics=(core_sem, _ARBITRARY),
            vmem_limit_bytes=vmem_limit,
        ),
    )(logits, tgt)
    # (num_cores, 1, 2) per-core partials -> (2,) totals
    return jnp.sum(out.reshape(num_cores, 2), axis=0)


def dtp_loss_rb2(token_preds, token_targets, value_preds, value_targets, value_mask,
                 classification_weight=1.0, regression_weight=1.0, alpha=ALPHA):
    """Functional equivalent of DTP_Loss_RB2.forward.

    Returns (combined_loss, classification_loss, regression_loss, new_class_w, new_reg_w).
    The last two correspond to the in-place .data mutation of the PyTorch parameters.
    """
    B, T, V = token_preds.shape
    N = B * T
    # Stream logits in their native dtype (e.g. bf16); the kernel upcasts only the exp path.
    logits = token_preds.reshape(N, V)
    tgt = token_targets.reshape(N, 1).astype(jnp.int32)

    ce_sum, ce_cnt = _ce_sums(logits, tgt)
    classification_loss = jnp.where(ce_cnt > 0, ce_sum / jnp.maximum(ce_cnt, 1.0), 0.0)

    # O(N) masked MSE: plain jnp in the wrapper (XLA fuses); not worth extra DMA streams.
    vm = value_mask.reshape(-1).astype(jnp.float32)
    diff = (value_preds.reshape(-1).astype(jnp.float32)
            - value_targets.reshape(-1).astype(jnp.float32))
    se_sum = jnp.sum(diff * diff * vm)
    se_cnt = jnp.sum(vm)
    regression_loss = jnp.where(se_cnt > 0, se_sum / jnp.maximum(se_cnt, 1.0), 0.0)

    # Data-dependent weight update (PyTorch does this via .data mutation), done functionally.
    cw = jnp.asarray(classification_weight, jnp.float32)
    rw = jnp.asarray(regression_weight, jnp.float32)
    cls_smaller = classification_loss < regression_loss
    cw = jnp.where(cls_smaller, cw * alpha, cw)
    rw = jnp.where(cls_smaller, rw, rw * alpha)
    total = jnp.maximum(cw, rw)
    cw = cw / total
    rw = rw / total

    combined_loss = cw * classification_loss + rw * regression_loss
    return combined_loss, classification_loss, regression_loss, cw, rw


def _reference(token_preds, token_targets, value_preds, value_targets, value_mask):
    # pure-JAX reference for validation
    B, T, V = token_preds.shape
    logits = token_preds.reshape(-1, V).astype(jnp.float32)
    tgt = token_targets.reshape(-1)
    logp = jax.nn.log_softmax(logits, axis=-1)
    nll = -jnp.take_along_axis(logp, tgt[:, None], axis=-1)[:, 0]
    valid = (tgt != PAD_ID).astype(jnp.float32)
    ce = jnp.sum(nll * valid) / jnp.maximum(jnp.sum(valid), 1.0)
    m = value_mask.reshape(-1).astype(jnp.float32)
    se = (value_preds.reshape(-1) - value_targets.reshape(-1)) ** 2
    mse = jnp.where(jnp.sum(m) > 0, jnp.sum(se * m) / jnp.maximum(jnp.sum(m), 1.0), 0.0)
    return ce, mse


if __name__ == "__main__":
    key = jax.random.PRNGKey(0)
    B, T, V = 2, 8, 32  # small shapes: batch=2, seq=8, vocab=32 (pad id = 0)

    k1, k2, k3, k4 = jax.random.split(key, 4)
    token_preds = jax.random.normal(k1, (B, T, V), dtype=jnp.float32)
    token_targets = jax.random.randint(k2, (B, T), 0, V, dtype=jnp.int32)
    # force a couple of pad tokens so ignore_index is exercised
    token_targets = token_targets.at[0, 0].set(PAD_ID).at[1, 3].set(PAD_ID)
    value_preds = jax.random.normal(k3, (B, T), dtype=jnp.float32)
    value_targets = jax.random.normal(k4, (B, T), dtype=jnp.float32)
    # deterministic mask with both True and False entries
    value_mask = (jnp.arange(B * T).reshape(B, T) % 3) != 0

    combined, cls_loss, reg_loss, new_cw, new_rw = dtp_loss_rb2(
        token_preds, token_targets, value_preds, value_targets, value_mask)
    jax.block_until_ready((combined, cls_loss, reg_loss, new_cw, new_rw))

    # sanity check against pure-JAX reference (f32 path)
    ref_ce, ref_mse = _reference(token_preds, token_targets, value_preds,
                                 value_targets, value_mask)
    np.testing.assert_allclose(np.asarray(cls_loss), np.asarray(ref_ce), rtol=1e-5, atol=1e-5)
    np.testing.assert_allclose(np.asarray(reg_loss), np.asarray(ref_mse), rtol=1e-5, atol=1e-5)
    ref_cw, ref_rw = (2.0, 1.0) if float(ref_ce) < float(ref_mse) else (1.0, 2.0)
    tot = max(ref_cw, ref_rw)
    ref_combined = (ref_cw / tot) * float(ref_ce) + (ref_rw / tot) * float(ref_mse)
    np.testing.assert_allclose(float(combined), ref_combined, rtol=1e-5, atol=1e-5)

    # exercise the native-dtype (bf16) compute path as well; max/gather are exact in bf16
    tp_bf16 = token_preds.astype(jnp.bfloat16)
    _, cls_bf16, _, _, _ = dtp_loss_rb2(
        tp_bf16, token_targets, value_preds, value_targets, value_mask)
    jax.block_until_ready(cls_bf16)
    ref_ce_bf16, _ = _reference(tp_bf16.astype(jnp.float32), token_targets, value_preds,
                                value_targets, value_mask)
    np.testing.assert_allclose(np.asarray(cls_bf16), np.asarray(ref_ce_bf16),
                               rtol=1e-4, atol=1e-4)

    print("KERNEL_OK")
</pallas_src>

<mosaic_0001>
module attributes {stable_mosaic.version = 11 : i64} {
  func.func @kernel(%arg0: i32, %arg1: i32, %arg2: memref<16x32xf32, #tpu.memory_space<vmem>>, %arg3: memref<16x1xi32, #tpu.memory_space<vmem>>, %arg4: memref<1x1x2xf32, #tpu.memory_space<vmem>>, %arg5: memref<16x1xf32, #tpu.memory_space<vmem>>, %arg6: memref<16x1xf32, #tpu.memory_space<vmem>>) attributes {dimension_semantics = [#tpu.dimension_semantics<arbitrary>, #tpu.dimension_semantics<arbitrary>], iteration_bounds = array<i64: 1, 1>, scalar_prefetch = 0 : i64, scratch_operands = 2 : i64, tpu.core_type = #tpu.core_type<tc>, window_params = [{transform_indices = @transform_0, window_bounds = array<i64: 16, 32>}, {transform_indices = @transform_1, window_bounds = array<i64: 16, 1>}, {transform_indices = @transform_2, window_bounds = array<i64: 1, 1, 2>}]} {
    %c0_i32 = arith.constant 0 : i32
    %0 = arith.cmpi eq, %arg1, %c0_i32 : i32
    %1 = arith.extui %0 : i1 to i32
    %c0_i32_0 = arith.constant 0 : i32
    %2 = arith.cmpi ne, %1, %c0_i32_0 : i32
    scf.if %2 {
      %cst_20 = arith.constant 0.000000e+00 : f32
      %47 = vector.broadcast %cst_20 : f32 to vector<16x1xf32>
      %c0_21 = arith.constant 0 : index
      %c0_22 = arith.constant 0 : index
      %48 = vector.load %arg5[%c0_21, %c0_22] : memref<16x1xf32, #tpu.memory_space<vmem>>, vector<16x1xf32>
      tpu.vector_store %arg5[%c0_21, %c0_22], %47 {strides = array<i32>} : memref<16x1xf32, #tpu.memory_space<vmem>>, vector<16x1xf32>,
      %cst_23 = arith.constant 0.000000e+00 : f32
      %49 = vector.broadcast %cst_23 : f32 to vector<16x1xf32>
      %c0_24 = arith.constant 0 : index
      %c0_25 = arith.constant 0 : index
      %50 = vector.load %arg6[%c0_24, %c0_25] : memref<16x1xf32, #tpu.memory_space<vmem>>, vector<16x1xf32>
      tpu.vector_store %arg6[%c0_24, %c0_25], %49 {strides = array<i32>} : memref<16x1xf32, #tpu.memory_space<vmem>>, vector<16x1xf32>,
    } else {
    }
    %c0 = arith.constant 0 : index
    %c0_1 = arith.constant 0 : index
    %3 = vector.load %arg2[%c0, %c0_1] : memref<16x32xf32, #tpu.memory_space<vmem>>, vector<16x32xf32>
    %c0_2 = arith.constant 0 : index
    %c0_3 = arith.constant 0 : index
    %4 = vector.load %arg3[%c0_2, %c0_3] : memref<16x1xi32, #tpu.memory_space<vmem>>, vector<16x1xi32>
    %c1_i32 = arith.constant 1 : i32
    %5 = arith.muli %arg0, %c1_i32 : i32
    %6 = arith.addi %5, %arg1 : i32
    %c16_i32 = arith.constant 16 : i32
    %7 = arith.muli %6, %c16_i32 : i32
    %8 = tpu.iota {dimensions = array<i32: 0>} : vector<16x1xi32>
    %9 = vector.broadcast %7 : i32 to vector<16x1xi32>
    %10 = arith.addi %9, %8 : vector<16x1xi32>
    %c16_i32_4 = arith.constant 16 : i32
    %11 = vector.broadcast %c16_i32_4 : i32 to vector<16x1xi32>
    %12 = arith.cmpi slt, %10, %11 : vector<16x1xi32>
    %cst = arith.constant dense<0xFF800000> : vector<16xf32>
    %13 = vector.multi_reduction <maximumf>, %3, %cst [1] : vector<16x32xf32> to vector<16xf32>
    %14 = vector.shape_cast %13 : vector<16xf32> to vector<16x1xf32>
    %15 = tpu.iota {dimensions = array<i32: 1>} : vector<1x32xi32>
    %16 = vector.broadcast %15 : vector<1x32xi32> to vector<16x32xi32>
    %17 = vector.broadcast %4 : vector<16x1xi32> to vector<16x32xi32>
    %18 = arith.cmpi eq, %16, %17 : vector<16x32xi32>
    %cst_5 = arith.constant 0.000000e+00 : f32
    %19 = vector.broadcast %cst_5 : f32 to vector<16x32xf32>
    %20 = arith.select %18, %3, %19 : vector<16x32xi1>, vector<16x32xf32>
    %cst_6 = arith.constant dense<0.000000e+00> : vector<16xf32>
    %21 = vector.multi_reduction <add>, %20, %cst_6 [1] : vector<16x32xf32> to vector<16xf32>
    %22 = vector.shape_cast %21 : vector<16xf32> to vector<16x1xf32>
    %23 = vector.broadcast %14 : vector<16x1xf32> to vector<16x32xf32>
    %24 = arith.subf %3, %23 : vector<16x32xf32>
    %25 = math.exp %24 : vector<16x32xf32>
    %cst_7 = arith.constant dense<0.000000e+00> : vector<16xf32>
    %26 = vector.multi_reduction <add>, %25, %cst_7 [1] : vector<16x32xf32> to vector<16xf32>
    %27 = vector.shape_cast %26 : vector<16xf32> to vector<16x1xf32>
    %28 = math.log %27 : vector<16x1xf32>
    %29 = arith.addf %14, %28 : vector<16x1xf32>
    %30 = arith.subf %29, %22 : vector<16x1xf32>
    %c0_i32_8 = arith.constant 0 : i32
    %31 = vector.broadcast %c0_i32_8 : i32 to vector<16x1xi32>
    %32 = arith.cmpi ne, %4, %31 : vector<16x1xi32>
    %33 = arith.andi %12, %32 : vector<16x1xi1>
    %c0_9 = arith.constant 0 : index
    %c0_10 = arith.constant 0 : index
    %34 = vector.load %arg5[%c0_9, %c0_10] : memref<16x1xf32, #tpu.memory_space<vmem>>, vector<16x1xf32>
    %cst_11 = arith.constant 0.000000e+00 : f32
    %35 = vector.broadcast %cst_11 : f32 to vector<16x1xf32>
    %36 = arith.select %33, %30, %35 : vector<16x1xi1>, vector<16x1xf32>
    %37 = arith.addf %34, %36 : vector<16x1xf32>
    %c0_12 = arith.constant 0 : index
    %c0_13 = arith.constant 0 : index
    %38 = vector.load %arg5[%c0_12, %c0_13] : memref<16x1xf32, #tpu.memory_space<vmem>>, vector<16x1xf32>
    tpu.vector_store %arg5[%c0_12, %c0_13], %37 {strides = array<i32>} : memref<16x1xf32, #tpu.memory_space<vmem>>, vector<16x1xf32>,
    %c0_14 = arith.constant 0 : index
    %c0_15 = arith.constant 0 : index
    %39 = vector.load %arg6[%c0_14, %c0_15] : memref<16x1xf32, #tpu.memory_space<vmem>>, vector<16x1xf32>
    %40 = arith.extui %33 : vector<16x1xi1> to vector<16x1xi32>
    %41 = arith.sitofp %40 : vector<16x1xi32> to vector<16x1xf32>
    %42 = arith.addf %39, %41 : vector<16x1xf32>
    %c0_16 = arith.constant 0 : index
    %c0_17 = arith.constant 0 : index
    %43 = vector.load %arg6[%c0_16, %c0_17] : memref<16x1xf32, #tpu.memory_space<vmem>>, vector<16x1xf32>
    tpu.vector_store %arg6[%c0_16, %c0_17], %42 {strides = array<i32>} : memref<16x1xf32, #tpu.memory_space<vmem>>, vector<16x1xf32>,
    %c0_i32_18 = arith.constant 0 : i32
    %44 = arith.cmpi eq, %arg1, %c0_i32_18 : i32
    %45 = arith.extui %44 : i1 to i32
    %c0_i32_19 = arith.constant 0 : i32
    %46 = arith.cmpi ne, %45, %c0_i32_19 : i32
    scf.if %46 {
      %c0_20 = arith.constant 0 : index
      %c0_21 = arith.constant 0 : index
      %47 = vector.load %arg5[%c0_20, %c0_21] : memref<16x1xf32, #tpu.memory_space<vmem>>, vector<16x1xf32>
      %cst_22 = arith.constant dense<0.000000e+00> : vector<1xf32>
      %48 = vector.multi_reduction <add>, %47, %cst_22 [0] : vector<16x1xf32> to vector<1xf32>
      %49 = vector.shape_cast %48 : vector<1xf32> to vector<1x1xf32>
      %c0_23 = arith.constant 0 : index
      %c0_24 = arith.constant 0 : index
      %50 = vector.load %arg6[%c0_23, %c0_24] : memref<16x1xf32, #tpu.memory_space<vmem>>, vector<16x1xf32>
      %cst_25 = arith.constant dense<0.000000e+00> : vector<1xf32>
      %51 = vector.multi_reduction <add>, %50, %cst_25 [0] : vector<16x1xf32> to vector<1xf32>
      %52 = vector.shape_cast %51 : vector<1xf32> to vector<1x1xf32>
      %53 = tpu.concatenate %49, %52 in 1 : vector<1x1xf32>, vector<1x1xf32> -> vector<1x2xf32>
      %54 = vector.shape_cast %53 : vector<1x2xf32> to vector<1x1x2xf32>
      %c0_26 = arith.constant 0 : index
      %c0_27 = arith.constant 0 : index
      %c0_28 = arith.constant 0 : index
      %55 = vector.load %arg4[%c0_26, %c0_27, %c0_28] : memref<1x1x2xf32, #tpu.memory_space<vmem>>, vector<1x1x2xf32>
      tpu.vector_store %arg4[%c0_26, %c0_27, %c0_28], %54 {strides = array<i32>} : memref<1x1x2xf32, #tpu.memory_space<vmem>>, vector<1x1x2xf32>,
    } else {
    }
    return
  }
  func.func @transform_0(%arg0: i32, %arg1: i32) -> (i32, i32) {
    %c1_i32 = arith.constant 1 : i32
    %0 = arith.muli %arg0, %c1_i32 : i32
    %1 = arith.addi %0, %arg1 : i32
    %c0_i32 = arith.constant 0 : i32
    %2 = arith.minsi %1, %c0_i32 : i32
    %c0_i32_0 = arith.constant 0 : i32
    %c0_i32_1 = arith.constant 0 : i32
    return %2, %c0_i32_0 : i32, i32
  }
  func.func @transform_1(%arg0: i32, %arg1: i32) -> (i32, i32) {
    %c1_i32 = arith.constant 1 : i32
    %0 = arith.muli %arg0, %c1_i32 : i32
    %1 = arith.addi %0, %arg1 : i32
    %c0_i32 = arith.constant 0 : i32
    %2 = arith.minsi %1, %c0_i32 : i32
    %c0_i32_0 = arith.constant 0 : i32
    %c0_i32_1 = arith.constant 0 : i32
    return %2, %c0_i32_0 : i32, i32
  }
  func.func @transform_2(%arg0: i32, %arg1: i32) -> (i32, i32, i32) {
    %c0_i32 = arith.constant 0 : i32
    %c0_i32_0 = arith.constant 0 : i32
    %c0_i32_1 = arith.constant 0 : i32
    return %arg0, %c0_i32, %c0_i32_0 : i32, i32, i32
  }
}

</mosaic_0001>

<bundles_post_ra>
// kernel: tpu_custom_call.1
= control target key start
LH: loop header
LB: loop body
LE: loop exit
PB: predicated region body
PF: predicated region fallthrough
CT: control target
= control target key end

     0   :  { %7 = vsyncpa [#allocation5], 0  ;;  %s389_s0 = inlined_call_operand.hbm [shape: f32[16,32], index: 0, kind: input, shape index: {}]   ;;  %s390_s1 = inlined_call_operand.hbm [shape: s32[16,1], index: 1, kind: input, shape index: {}]   ;;  %s391_s2 = inlined_call_operand.hbm [shape: f32[1,1,2], index: 2, kind: output, shape index: {}]  }
   0x1   :  { %8 = vsyncpa [#allocation8], 0 }
   0x2   :  { %9 = vsyncpa [#allocation6], 0  ;;  %s295_s9 = smov [#allocation4]   ;;  %s223_s13 = scalar_lea.hbm %s389_s0, 256 }
   0x3   :  { %s21_s10 = sshll.u32 %s295_s9, 4  ;;  %p224_p0 = scmp.ne.s32.totalorder %s389_s0, %s223_s13  ;;  %s22_s10 = int_to_ptr.vmem [resolvable:$true] %s21_s10 }
   0x4   :  { %p227_p1 = scmp.lt.u32.totalorder %s223_s13, %s389_s0 }
   0x6   :  { %p229_p2 = pnand %p227_p1, %p224_p0 }
   0x8   :  { %232 = shalt.err (!%p229_p2)
}
   0x9   :  { %s233_s18 = scalar_lea.vmem %s22_s10, 256  ;;  %p238_p4 = scmp.lt.s32.totalorder %s22_s10, %s22_s10 }
   0xa   :  { %p234_p3 = scmp.ne.s32.totalorder %s22_s10, %s233_s18  ;;  %p239_p5 = scmp.lt.s32.totalorder %s233_s18, %s233_s18 }
   0xc   :  { %p240_p6 = por %p239_p5, %p238_p4 }
   0xe   :  { %p241_p7 = pnand %p240_p6, %p234_p3 }
  0x10   :  { %244 = shalt.err (!%p241_p7)
}
  0x11   :  { %s296_s19 = smov 128   ;;  %s297_s20 = smov 8  }
  0x12   :  { %27 = dma.hbm_to_vmem [thread:$0]  %s389_s0, 256, %s22_s10, [#allocation5], %s296_s19, %s296_s19, %s297_s20  }
  0x13   :  { %s298_s23 = smov [#allocation7]   ;;  %s245_s27 = scalar_lea.hbm %s390_s1, 256 }
  0x14   :  { %s39_s24 = sshll.u32 %s298_s23, 4  ;;  %p246_p8 = scmp.ne.s32.totalorder %s390_s1, %s245_s27  ;;  %s40_s24 = int_to_ptr.vmem [resolvable:$true] %s39_s24 }
  0x15   :  { %p249_p9 = scmp.lt.u32.totalorder %s245_s27, %s390_s1 }
  0x17   :  { %p251_p10 = pnand %p249_p9, %p246_p8 }
  0x19   :  { %254 = shalt.err (!%p251_p10)
}
  0x1a   :  { %s255_s4 = scalar_lea.vmem %s40_s24, 256  ;;  %p260_p12 = scmp.lt.s32.totalorder %s40_s24, %s40_s24 }
  0x1b   :  { %p256_p11 = scmp.ne.s32.totalorder %s40_s24, %s255_s4  ;;  %p261_p13 = scmp.lt.s32.totalorder %s255_s4, %s255_s4 }
  0x1d   :  { %p262_p0 = por %p261_p13, %p260_p12 }
  0x1f   :  { %p263_p1 = pnand %p262_p0, %p256_p11 }
  0x21   :  { %266 = shalt.err (!%p263_p1)
}
  0x22   :  { %45 = dma.hbm_to_vmem [thread:$0]  %s390_s1, 256, %s40_s24, [#allocation8], %s296_s19, %s296_s19, %s297_s20  }
  0x23   :  { %289 = dma.done.wait [#allocation5], 256  }
  0x24   :  { %290 = vsyncadd [#allocation5], 4294967040 }
  0x25   :  { %291 = dma.done.wait [#allocation8], 256  }
  0x26   :  { %292 = vsyncadd [#allocation8], 4294967040  ;;  %vm64_vm0 = vcmask 7168   ;;  %v299_v0 = vmov 0   ;;  %v300_v1 = vmov 0.0   ;;  %vm83_vm1 = vcmask 261120  }
  0x27   :  { %213 = vset.pattern.permute.xlu1 %v299_v0  ;;  %67 = vst.msk [vmem:[#allocation3] sm:$0xff] %vm64_vm0, %v300_v1  ;;  %65 = vst.msk [vmem:[#allocation2] sm:$0xff] %vm64_vm0, %v300_v1  ;;  %214 = vset.pattern.permute.xlu0 %v299_v0  ;;  %v69_v2 = vld [vmem:[#allocation4] sm:$0xff]  ;;  %v70_v3 = vld [vmem:[#allocation4 + $0x8] sm:$0xff]  ;;  %v90_v18 = vlaneseq  ;;  %s301_s1 = smov 1   ;;  %s302_s6 = smov [#allocation9]  }
  0x28   :  { %66 = vst.msk [vmem:[#allocation2 + $0x8] sm:$0xff] %vm64_vm0, %v300_v1  ;;  %68 = vst.msk [vmem:[#allocation3 + $0x8] sm:$0xff] %vm64_vm0, %v300_v1  ;;  %v346_v4 = vld [vmem:[#allocation7] sm:$0xff]  ;;  %v84_v5 = vsel %vm83_vm1, %v69_v2, -inf  ;;  %v351_v7 = vld [vmem:[#allocation7 + $0x8] sm:$0xff]  ;;  %v87_v10 = vsel %vm83_vm1, %v70_v3, -inf }
  0x29   :  { %93 = vperm.xlu1 %213, %v346_v4   ;;  %vm128_vm2 = vcmp.ne.s32.totalorder %v346_v4, 0  ;;  %85 = vmax.xlane.f32.xlu0 %v84_v5  ;;  %vm129_vm3 = vcmp.ne.s32.totalorder %v351_v7, 0  ;;  %v91_v22 = vand.u32 127, %v90_v18  ;;  %s189_s7 = sshll.u32 %s302_s6, 4  ;;  %vm181_vm6 = vcmask 8192   ;;  %s190_s7 = int_to_ptr.vmem [resolvable:$true] %s189_s7 }
  0x2a   :  { %v203_v9 = vsel %vm128_vm2, 1.0, %v300_v1  ;;  %v204_v12 = vsel %vm129_vm3, 1.0, %v300_v1  ;;  %s267_s8 = scalar_lea.vmem %s190_s7, 16  ;;  %s271_s9 = scalar_lea.vmem %s190_s7, 32 }
  0x2b   :  { %p268_p2 = scmp.ne.s32.totalorder %s190_s7, %s267_s8  ;;  %p272_p3 = scmp.lt.s32.totalorder %s190_s7, %s190_s7 }
  0x2c   :  { %p273_p4 = scmp.lt.s32.totalorder %s271_s9, %s267_s8 }
  0x2d   :  { %96 = vperm.xlu1 %213, %v351_v7   ;;  %88 = vmax.xlane.f32.xlu0 %v87_v10 }
  0x2e   :  { %v141_v6 = vld [vmem:[#allocation3] sm:$0xff]  ;;  %v132_v52 = vld [vmem:[#allocation2] sm:$0xff]  ;;  %p274_p5 = por %p273_p4, %p272_p3 }
  0x2f   :  { %v142_v8 = vld [vmem:[#allocation3 + $0x8] sm:$0xff]  ;;  %v147_v11 = vadd.f32 %v203_v9, %v141_v6  ;;  %v133_v58 = vld [vmem:[#allocation2 + $0x8] sm:$0xff] }
  0x30   :  { %v148_v13 = vadd.f32 %v204_v12, %v142_v8  ;;  %p275_p6 = pnand %p274_p5, %p268_p2 }
  0x31   :  { %149 = vst.msk [vmem:[#allocation3] sm:$0xff] %vm64_vm0, %v147_v11 }
  0x32   :  { %150 = vst.msk [vmem:[#allocation3 + $0x8] sm:$0xff] %vm64_vm0, %v148_v13 }
  0x38   :  { %v165_v24 = vld [vmem:[#allocation3] sm:$0xff] }
  0x39   :  { %v166_v25 = vld [vmem:[#allocation3 + $0x8] sm:$0xff]  ;;  %v167_v29 = vsel %vm64_vm0, %v165_v24, 0.0 }
  0x3a   :  { %v168_v30 = vsel %vm64_vm0, %v166_v25, 0.0 }
  0x3b   :  { %v169_v34 = vadd.f32 %v168_v30, %v167_v29 }
  0x3d   :  { %v170_v37 = vrot.slane %v169_v34, 4 }
  0x3f   :  { %v171_v38 = vadd.f32 %v170_v37, %v169_v34 }
  0x41   :  { %v172_v39 = vrot.slane %v171_v38, 2 }
  0x43   :  { %v173_v40 = vadd.f32 %v172_v39, %v171_v38 }
  0x45   :  { %v174_v41 = vrot.slane %v173_v40, 1 }
  0x47   :  { %v175_v42 = vadd.f32 %v174_v41, %v173_v40 }
  0xa8   :  { %v94_v21 = vpop.permute.xlu1 %93 }
  0xa9   :  { %vm98_vm4 = vcmp.eq.s32.totalorder %v91_v22, %v94_v21 }
  0xaa   :  { %v100_v27 = vsel %vm98_vm4, %v69_v2, 0.0 }
  0xab   :  { %v102_v31 = vsel %vm83_vm1, %v100_v27, 0.0 }
  0xac   :  { %v97_v23 = vpop.permute.xlu1 %96 }
  0xad   :  { %vm99_vm5 = vcmp.eq.s32.totalorder %v91_v22, %v97_v23 }
  0xae   :  { %v101_v33 = vsel %vm99_vm5, %v70_v3, 0.0 }
  0xaf   :  { %v105_v36 = vsel %vm83_vm1, %v101_v33, 0.0 }
  0xb6   :  { %v86_v14 = vpop.xlane.xlu0 %85 }
  0xb7   :  { %v108_v15 = vsub.f32 %v69_v2, %v86_v14 }
  0xb9   :  { %v110_v16 = vmul.f32 1.442695, %v108_v15 }
  0xba   :  { %v89_v17 = vpop.xlane.xlu0 %88 }
  0xbb   :  { %215 = vpow2.f32 %v110_v16  ;;  %v109_v19 = vsub.f32 %v70_v3, %v89_v17 }
  0xbd   :  { %v112_v20 = vmul.f32 1.442695, %v109_v19 }
  0xbf   :  { %217 = vpow2.f32 %v112_v20 }
  0xc5   :  { %v216_v26 = vpop.eup %215 }
  0xc6   :  { %v114_v28 = vsel %vm83_vm1, %v216_v26, 0.0 }
  0xc7   :  { %115 = vadd.xlane.f32.xlu0 %v114_v28 }
  0xc9   :  { %v218_v32 = vpop.eup %217 }
  0xca   :  { %v117_v35 = vsel %vm83_vm1, %v218_v32, 0.0 }
  0xcb   :  { %118 = vadd.xlane.f32.xlu1 %v117_v35  ;;  %103 = vadd.xlane.f32.xlu0 %v102_v31 }
  0xcf   :  { %106 = vadd.xlane.f32.xlu0 %v105_v36 }
  0xe5   :  { %177 = vrot.lane.b32.xlu0 %v175_v42, %s301_s1 }
 0x154   :  { %v116_v43 = vpop.xlane.xlu0 %115 }
 0x155   :  { %219 = vlog2.f32 %v116_v43 }
 0x158   :  { %v119_v44 = vpop.xlane.xlu1 %118  ;;  %v104_v47 = vpop.xlane.xlu0 %103 }
 0x159   :  { %221 = vlog2.f32 %v119_v44 }
 0x15c   :  { %v107_v56 = vpop.xlane.xlu0 %106 }
 0x15f   :  { %v220_v45 = vpop.eup %219 }
 0x160   :  { %v121_v46 = vmul.f32 0.6931472, %v220_v45  ;;  %v178_v8 = vpop.permute.xlu0 %177 }
 0x162   :  { %v124_v48 = vadd.f32 %v121_v46, %v86_v14 }
 0x163   :  { %v222_v49 = vpop.eup %221 }
 0x164   :  { %v123_v50 = vmul.f32 0.6931472, %v222_v49  ;;  %v126_v51 = vsub.f32 %v124_v48, %v104_v47 }
 0x166   :  { %v134_v53 = vsel %vm128_vm2, %v126_v51, 0.0  ;;  %v125_v54 = vadd.f32 %v123_v50, %v89_v17 }
 0x167   :  { %v136_v55 = vadd.f32 %v134_v53, %v132_v52 }
 0x168   :  { %v127_v57 = vsub.f32 %v125_v54, %v107_v56 }
 0x169   :  { %139 = vst.msk [vmem:[#allocation2] sm:$0xff] %vm64_vm0, %v136_v55 }
 0x16a   :  { %v135_v59 = vsel %vm129_vm3, %v127_v57, 0.0 }
 0x16b   :  { %v137_v60 = vadd.f32 %v135_v59, %v133_v58 }
 0x16d   :  { %140 = vst.msk [vmem:[#allocation2 + $0x8] sm:$0xff] %vm64_vm0, %v137_v60 }
 0x170   :  { %v154_v61 = vld [vmem:[#allocation2] sm:$0xff] }
 0x171   :  { %v156_v63 = vsel %vm64_vm0, %v154_v61, 0.0 }
 0x174   :  { %v155_v62 = vld [vmem:[#allocation2 + $0x8] sm:$0xff] }
 0x175   :  { %v157_v0 = vsel %vm64_vm0, %v155_v62, 0.0 }
 0x176   :  { %v158_v1 = vadd.f32 %v157_v0, %v156_v63 }
 0x178   :  { %v159_v2 = vrot.slane %v158_v1, 4 }
 0x17a   :  { %v160_v3 = vadd.f32 %v159_v2, %v158_v1 }
 0x17c   :  { %v161_v4 = vrot.slane %v160_v3, 2 }
 0x17e   :  { %v162_v5 = vadd.f32 %v161_v4, %v160_v3 }
 0x180   :  { %v163_v6 = vrot.slane %v162_v5, 1 }
 0x182   :  { %v164_v7 = vadd.f32 %v163_v6, %v162_v5 }
 0x184   :  { %v180_v9 = vsel %vm64_vm0, %v164_v7, %v178_v8 }
 0x185   :  { %182 = vst.msk [vmem:[#allocation9] sm:$0x1] %vm181_vm6, %v180_v9 }
 0x186   :  { %278 = shalt.err (!%p275_p6)
}
 0x187   :  { %s279_s12 = scalar_lea.hbm %s391_s2, 16 }
 0x188   :  { %p280_p7 = scmp.ne.s32.totalorder %s391_s2, %s279_s12  ;;  %p283_p8 = scmp.lt.u32.totalorder %s279_s12, %s391_s2 }
 0x18a   :  { %p285_p9 = pnand %p283_p8, %p280_p7 }
 0x18c   :  { %288 = shalt.err (!%p285_p9)
}
 0x18d   :  { %192 = dma.vmem_to_hbm [thread:$0]  %s190_s7, 16, %s391_s2, [#allocation6]  }
 0x18e   :  { %293 = dma.done.wait [#allocation6], 16  }
 0x18f   :  { %294 = vsyncadd [#allocation6], 4294967280 }
 0x190   :  { %196 = vsyncpa [#allocation5], 1 }
 0x191   :  { %197 = vsyncpa [#allocation8], 1 }
 0x192   :  { %198 = vsyncpa [#allocation6], 1 }

</bundles_post_ra>
